<compile_context>
chip_gen: v7x
topology: tpu7x:2x2x1
jax: 0.10.0
libtpu: 0.0.40
codegen_flags: <defaults>
</compile_context>

<pallas_src>
import functools

import jax
import jax.numpy as jnp
from jax.experimental import pallas as pl
from jax.experimental.pallas import tpu as pltpu

LANE = 128


# ----------------------------------------------------------------------------
# Fused Pallas kernel: 2-layer hetero-RGCN over the ('user','item') graph
# ----------------------------------------------------------------------------
def hetero_rgcn_fused_kernel(
    a_blk_ref,      # (N, N)           [[0, a_iu], [a_ui, 0]]   rows = [user; item]
    x_all_ref,      # (N, d_in_p)      row-stacked features, lane d_in == 1.0
    w1_ref,         # (2*d_in_p, 2*d_hid_p)  [user half; item half], each [W_rel|W_self], bias row at d_in
    w2_ref,         # (2*d_hid_p, 2*d_out_p) same layout, bias row at d_hid
    h_out_ref,      # (N, d_out_p)
    cat1_scr,       # VMEM (N, 2*d_hid_p)
    cat2_scr,       # VMEM (N, 2*d_out_p)
    *, n_user, d_in_p, d_hid, d_hid_p, d_out_p, negative_slope):
    f32 = jnp.float32
    a_blk = a_blk_ref[...]

    # ---------------- layer 1 ----------------
    # One stacked [W_rel | W_self] matmul per source type -> [Wh | h0] in one
    # 256-lane result (bias rides in the contraction via the 1.0 feature lane).
    w1 = w1_ref[...]
    cat1_scr[:n_user, :] = jnp.dot(x_all_ref[:n_user, :], w1[:d_in_p, :],
                                   preferred_element_type=f32)
    cat1_scr[n_user:, :] = jnp.dot(x_all_ref[n_user:, :], w1[d_in_p:, :],
                                   preferred_element_type=f32)
    cat1 = cat1_scr[...]
    wh1 = cat1[:, :d_hid_p]          # row-stacked relation messages [wh_u; wh_i]
    h0_1 = cat1[:, d_hid_p:]         # row-stacked self terms        [h0_u; h0_i]

    # Block-anti-diagonal aggregation: both relations' mean-agg in one matmul.
    h1 = jnp.dot(a_blk, wh1, preferred_element_type=f32) + h0_1

    # leaky_relu between the two layers (mul + max, no compare/select).
    h1 = jnp.maximum(h1, negative_slope * h1)

    # Fold layer-2 biases: padded lanes of h1 are exactly zero, so writing 1.0
    # into lane d_hid makes the bias row of w2 ride through the next matmul.
    lane = jax.lax.broadcasted_iota(jnp.int32, h1.shape, 1)
    h1 = jnp.where(lane == d_hid, jnp.float32(1.0), h1)

    # ---------------- layer 2 ----------------
    w2 = w2_ref[...]
    cat2_scr[:n_user, :] = jnp.dot(h1[:n_user, :], w2[:d_hid_p, :],
                                   preferred_element_type=f32)
    cat2_scr[n_user:, :] = jnp.dot(h1[n_user:, :], w2[d_hid_p:, :],
                                   preferred_element_type=f32)
    cat2 = cat2_scr[...]
    wh2 = cat2[:, :d_out_p]
    h0_2 = cat2[:, d_out_p:]

    # Single lane-dense output store (user rows first, then item rows).
    h_out_ref[...] = jnp.dot(a_blk, wh2, preferred_element_type=f32) + h0_2


# ----------------------------------------------------------------------------
# Wrapper: weight packing, bias folding, lane padding + single pallas_call
# ----------------------------------------------------------------------------
def _pack_layer(w_rel_u, w_rel_i, w_self, b_rel_u, b_rel_i, b_self,
                d_src, d_src_p, d_dst, d_dst_p):
    """Pack [W_rel | W_self] per source type with bias folded at row d_src.

    Returns a (2*d_src_p, 2*d_dst_p) f32 block:
      rows [0:d_src_p)       -> user-source half
      rows [d_src_p:2*d_src_p) -> item-source half
    """
    def half(w_rel, b_rel):
        blk = jnp.zeros((d_src_p, 2 * d_dst_p), jnp.float32)
        blk = blk.at[:d_src, :d_dst].set(w_rel.astype(jnp.float32))
        blk = blk.at[:d_src, d_dst_p:d_dst_p + d_dst].set(w_self.astype(jnp.float32))
        blk = blk.at[d_src, :d_dst].set(b_rel.reshape(-1).astype(jnp.float32))
        blk = blk.at[d_src, d_dst_p:d_dst_p + d_dst].set(b_self.reshape(-1).astype(jnp.float32))
        return blk

    return jnp.concatenate([half(w_rel_u, b_rel_u), half(w_rel_i, b_rel_i)], axis=0)


def hetero_rgcn_forward(params, g, feat_dict, negative_slope=0.01):
    p = params
    a_ui = g[("user", "likes", "item")].astype(jnp.float32)   # (N_item, N_user)
    a_iu = g[("item", "liked_by", "user")].astype(jnp.float32)  # (N_user, N_item)
    x_u = feat_dict["user"].astype(jnp.float32)
    x_i = feat_dict["item"].astype(jnp.float32)

    n_u, d_in = x_u.shape
    n_i = x_i.shape[0]
    n_tot = n_u + n_i
    d_hid = p["W1_self"].shape[1]
    d_out = p["W2_self"].shape[1]

    # Pad feature dims to 128-lane widths; the "+1" guarantees a free padded
    # lane for the folded-bias 1.0 column (zero padding is exact).
    d_in_p = pl.cdiv(d_in + 1, LANE) * LANE
    d_hid_p = pl.cdiv(d_hid + 1, LANE) * LANE
    d_out_p = pl.cdiv(d_out, LANE) * LANE

    # Row-stacked, lane-padded features with the bias 1.0 lane at column d_in.
    def pad_feat(x, n):
        xp = jnp.zeros((n, d_in_p), jnp.float32)
        xp = xp.at[:, :d_in].set(x)
        xp = xp.at[:, d_in].set(1.0)
        return xp

    x_all = jnp.concatenate([pad_feat(x_u, n_u), pad_feat(x_i, n_i)], axis=0)

    # Block-anti-diagonal aggregation matrix (rows/cols ordered [user; item]).
    a_blk = jnp.zeros((n_tot, n_tot), jnp.float32)
    a_blk = a_blk.at[:n_u, n_u:].set(a_iu)
    a_blk = a_blk.at[n_u:, :n_u].set(a_ui)

    # Packed weight blocks (one per layer).
    w1_blk = _pack_layer(p["W1_likes"], p["W1_liked_by"], p["W1_self"],
                         p["b1_likes"], p["b1_liked_by"], p["b1_self"],
                         d_in, d_in_p, d_hid, d_hid_p)
    w2_blk = _pack_layer(p["W2_likes"], p["W2_liked_by"], p["W2_self"],
                         p["b2_likes"], p["b2_liked_by"], p["b2_self"],
                         d_hid, d_hid_p, d_out, d_out_p)

    vmem = pl.BlockSpec(memory_space=pltpu.MemorySpace.VMEM)
    h_all = pl.pallas_call(
        functools.partial(hetero_rgcn_fused_kernel,
                          n_user=n_u, d_in_p=d_in_p, d_hid=d_hid,
                          d_hid_p=d_hid_p, d_out_p=d_out_p,
                          negative_slope=negative_slope),
        out_shape=jax.ShapeDtypeStruct((n_tot, d_out_p), jnp.float32),
        in_specs=[vmem] * 4,
        out_specs=vmem,
        scratch_shapes=[pltpu.VMEM((n_tot, 2 * d_hid_p), jnp.float32),
                        pltpu.VMEM((n_tot, 2 * d_out_p), jnp.float32)],
    )(a_blk, x_all, w1_blk, w2_blk)

    return {"user": h_all[:n_u, :d_out], "item": h_all[n_u:, :d_out]}


class HeteroRGCNPallas:
    """JAX/Pallas port of HeteroRGCN (HeteroEmbedding + 2 HeteroRGCNLayers)."""

    def __init__(self, params, negative_slope=0.01):
        self.params = params
        self.negative_slope = negative_slope

    def __call__(self, g, feat_nids=None, eweight_dict=None):
        # TODO(synk): eweight_dict (fn.u_mul_e reweighting) is not supported here;
        # edge weights would be folded into the dense normalized adjacency.
        emb = self.params["emb"]
        if feat_nids is None:
            feat_dict = emb
        else:
            feat_dict = {k: emb[k][v] for k, v in feat_nids.items()}  # gather = glue
        return hetero_rgcn_forward(self.params, g, feat_dict, self.negative_slope)


# ----------------------------------------------------------------------------
# Pure-JAX reference (for correctness check)
# ----------------------------------------------------------------------------
def reference_forward(params, g, feat_dict, negative_slope=0.01):
    p = params
    a_ui = g[("user", "likes", "item")]
    a_iu = g[("item", "liked_by", "user")]

    def layer(x_u, x_i, wl, bl, wlb, blb, w0, b0):
        h_i = a_ui @ (x_u @ wl + bl) + (x_i @ w0 + b0)
        h_u = a_iu @ (x_i @ wlb + blb) + (x_u @ w0 + b0)
        return h_u, h_i

    h_u1, h_i1 = layer(feat_dict["user"], feat_dict["item"],
                       p["W1_likes"], p["b1_likes"],
                       p["W1_liked_by"], p["b1_liked_by"],
                       p["W1_self"], p["b1_self"])
    lrelu = lambda x: jnp.where(x > 0, x, negative_slope * x)
    h_u1, h_i1 = lrelu(h_u1), lrelu(h_i1)
    h_u2, h_i2 = layer(h_u1, h_i1,
                       p["W2_likes"], p["b2_likes"],
                       p["W2_liked_by"], p["b2_liked_by"],
                       p["W2_self"], p["b2_self"])
    return {"user": h_u2, "item": h_i2}


# ----------------------------------------------------------------------------
# Main
# ----------------------------------------------------------------------------
if __name__ == "__main__":
    key = jax.random.PRNGKey(0)
    N_USER, N_ITEM = 16, 24
    EMB_DIM, HIDDEN, OUT = 32, 32, 32

    keys = jax.random.split(key, 20)

    # HeteroEmbedding weights (used as node features, feat_nids=None path)
    emb = {
        "user": jax.random.normal(keys[0], (N_USER, EMB_DIM), jnp.float32),
        "item": jax.random.normal(keys[1], (N_ITEM, EMB_DIM), jnp.float32),
    }

    # dense, in-degree(mean)-normalized adjacency per canonical edge type
    a_ui_raw = (jax.random.uniform(keys[2], (N_ITEM, N_USER)) < 0.3).astype(jnp.float32)
    a_iu_raw = (jax.random.uniform(keys[3], (N_USER, N_ITEM)) < 0.3).astype(jnp.float32)
    a_ui = a_ui_raw / jnp.maximum(a_ui_raw.sum(1, keepdims=True), 1.0)
    a_iu = a_iu_raw / jnp.maximum(a_iu_raw.sum(1, keepdims=True), 1.0)
    graph = {("user", "likes", "item"): a_ui,
             ("item", "liked_by", "user"): a_iu}

    def glorot(k, fan_in, fan_out):
        return jax.random.normal(k, (fan_in, fan_out), jnp.float32) / jnp.sqrt(fan_in)

    def bias(k, fan_out):
        return 0.1 * jax.random.normal(k, (1, fan_out), jnp.float32)

    params = {
        "emb": emb,
        # layer 1: per-etype Linear + shared weight0 Linear (with biases)
        "W1_likes": glorot(keys[4], EMB_DIM, HIDDEN), "b1_likes": bias(keys[5], HIDDEN),
        "W1_liked_by": glorot(keys[6], EMB_DIM, HIDDEN), "b1_liked_by": bias(keys[7], HIDDEN),
        "W1_self": glorot(keys[8], EMB_DIM, HIDDEN), "b1_self": bias(keys[9], HIDDEN),
        # layer 2
        "W2_likes": glorot(keys[10], HIDDEN, OUT), "b2_likes": bias(keys[11], OUT),
        "W2_liked_by": glorot(keys[12], HIDDEN, OUT), "b2_liked_by": bias(keys[13], OUT),
        "W2_self": glorot(keys[14], HIDDEN, OUT), "b2_self": bias(keys[15], OUT),
    }

    model = HeteroRGCNPallas(params)
    h = model(graph)                      # feat_nids=None -> embedding weights
    h = jax.block_until_ready(h)

    ref = reference_forward(params, graph, emb)

    assert h["user"].shape == (N_USER, OUT)
    assert h["item"].shape == (N_ITEM, OUT)
    assert jnp.allclose(h["user"], ref["user"], atol=1e-4, rtol=1e-4)
    assert jnp.allclose(h["item"], ref["item"], atol=1e-4, rtol=1e-4)

    print("KERNEL_OK")
</pallas_src>

<mosaic_0001>
module attributes {stable_mosaic.version = 11 : i64} {
  func.func @hetero_rgcn_fused_kernel(%arg0: memref<40x40xf32, #tpu.memory_space<vmem>>, %arg1: memref<40x128xf32, #tpu.memory_space<vmem>>, %arg2: memref<256x256xf32, #tpu.memory_space<vmem>>, %arg3: memref<256x256xf32, #tpu.memory_space<vmem>>, %arg4: memref<40x128xf32, #tpu.memory_space<vmem>>, %arg5: memref<40x256xf32, #tpu.memory_space<vmem>>, %arg6: memref<40x256xf32, #tpu.memory_space<vmem>>) attributes {dimension_semantics = [], scalar_prefetch = 0 : i64, scratch_operands = 2 : i64, tpu.core_type = #tpu.core_type<tc>} {
    %c0 = arith.constant 0 : index
    %c0_0 = arith.constant 0 : index
    %0 = vector.load %arg0[%c0, %c0_0] : memref<40x40xf32, #tpu.memory_space<vmem>>, vector<40x40xf32>
    %c0_1 = arith.constant 0 : index
    %c0_2 = arith.constant 0 : index
    %1 = vector.load %arg2[%c0_1, %c0_2] : memref<256x256xf32, #tpu.memory_space<vmem>>, vector<256x256xf32>
    %c0_3 = arith.constant 0 : index
    %c0_4 = arith.constant 0 : index
    %2 = vector.load %arg1[%c0_3, %c0_4] : memref<40x128xf32, #tpu.memory_space<vmem>>, vector<16x128xf32>
    %3 = vector.extract_strided_slice %1 {offsets = [0, 0], sizes = [128, 256], strides = [1, 1]} : vector<256x256xf32> to vector<128x256xf32>
    %cst = arith.constant dense<0.000000e+00> : vector<16x256xf32>
    %4 = tpu.matmul %2, %3, %cst {dimension_numbers = #tpu.dot_dimension_numbers<[1], [0], [0], [1], [0, 0, 1, 1], [], []>} : vector<16x128xf32>, vector<128x256xf32>, vector<16x256xf32> -> vector<16x256xf32>
    %c0_5 = arith.constant 0 : index
    %c0_6 = arith.constant 0 : index
    %5 = vector.load %arg5[%c0_5, %c0_6] : memref<40x256xf32, #tpu.memory_space<vmem>>, vector<16x256xf32>
    tpu.vector_store %arg5[%c0_5, %c0_6], %4 {strides = array<i32>} : memref<40x256xf32, #tpu.memory_space<vmem>>, vector<16x256xf32>,
    %c16 = arith.constant 16 : index
    %c0_7 = arith.constant 0 : index
    %6 = vector.load %arg1[%c16, %c0_7] : memref<40x128xf32, #tpu.memory_space<vmem>>, vector<24x128xf32>
    %7 = vector.extract_strided_slice %1 {offsets = [128, 0], sizes = [128, 256], strides = [1, 1]} : vector<256x256xf32> to vector<128x256xf32>
    %cst_8 = arith.constant dense<0.000000e+00> : vector<24x256xf32>
    %8 = tpu.matmul %6, %7, %cst_8 {dimension_numbers = #tpu.dot_dimension_numbers<[1], [0], [0], [1], [0, 0, 1, 1], [], []>} : vector<24x128xf32>, vector<128x256xf32>, vector<24x256xf32> -> vector<24x256xf32>
    %c16_9 = arith.constant 16 : index
    %c0_10 = arith.constant 0 : index
    %9 = vector.load %arg5[%c16_9, %c0_10] : memref<40x256xf32, #tpu.memory_space<vmem>>, vector<24x256xf32>
    tpu.vector_store %arg5[%c16_9, %c0_10], %8 {strides = array<i32>} : memref<40x256xf32, #tpu.memory_space<vmem>>, vector<24x256xf32>,
    %c0_11 = arith.constant 0 : index
    %c0_12 = arith.constant 0 : index
    %10 = vector.load %arg5[%c0_11, %c0_12] : memref<40x256xf32, #tpu.memory_space<vmem>>, vector<40x256xf32>
    %11 = vector.extract_strided_slice %10 {offsets = [0, 0], sizes = [40, 128], strides = [1, 1]} : vector<40x256xf32> to vector<40x128xf32>
    %12 = vector.extract_strided_slice %10 {offsets = [0, 128], sizes = [40, 128], strides = [1, 1]} : vector<40x256xf32> to vector<40x128xf32>
    %cst_13 = arith.constant dense<0.000000e+00> : vector<40x128xf32>
    %13 = tpu.matmul %0, %11, %cst_13 {dimension_numbers = #tpu.dot_dimension_numbers<[1], [0], [0], [1], [0, 0, 1, 1], [], []>} : vector<40x40xf32>, vector<40x128xf32>, vector<40x128xf32> -> vector<40x128xf32>
    %14 = arith.addf %13, %12 : vector<40x128xf32>
    %cst_14 = arith.constant 0.00999999977 : f32
    %15 = vector.broadcast %cst_14 : f32 to vector<40x128xf32>
    %16 = arith.mulf %15, %14 : vector<40x128xf32>
    %17 = arith.maximumf %14, %16 : vector<40x128xf32>
    %18 = tpu.iota {dimensions = array<i32: 1>} : vector<40x128xi32>
    %c32_i32 = arith.constant 32 : i32
    %19 = vector.broadcast %c32_i32 : i32 to vector<40x128xi32>
    %20 = arith.cmpi eq, %18, %19 : vector<40x128xi32>
    %cst_15 = arith.constant 1.000000e+00 : f32
    %21 = vector.broadcast %cst_15 : f32 to vector<40x128xf32>
    %22 = arith.select %20, %21, %17 : vector<40x128xi1>, vector<40x128xf32>
    %c0_16 = arith.constant 0 : index
    %c0_17 = arith.constant 0 : index
    %23 = vector.load %arg3[%c0_16, %c0_17] : memref<256x256xf32, #tpu.memory_space<vmem>>, vector<256x256xf32>
    %24 = vector.extract_strided_slice %22 {offsets = [0, 0], sizes = [16, 128], strides = [1, 1]} : vector<40x128xf32> to vector<16x128xf32>
    %25 = vector.extract_strided_slice %23 {offsets = [0, 0], sizes = [128, 256], strides = [1, 1]} : vector<256x256xf32> to vector<128x256xf32>
    %cst_18 = arith.constant dense<0.000000e+00> : vector<16x256xf32>
    %26 = tpu.matmul %24, %25, %cst_18 {dimension_numbers = #tpu.dot_dimension_numbers<[1], [0], [0], [1], [0, 0, 1, 1], [], []>} : vector<16x128xf32>, vector<128x256xf32>, vector<16x256xf32> -> vector<16x256xf32>
    %c0_19 = arith.constant 0 : index
    %c0_20 = arith.constant 0 : index
    %27 = vector.load %arg6[%c0_19, %c0_20] : memref<40x256xf32, #tpu.memory_space<vmem>>, vector<16x256xf32>
    tpu.vector_store %arg6[%c0_19, %c0_20], %26 {strides = array<i32>} : memref<40x256xf32, #tpu.memory_space<vmem>>, vector<16x256xf32>,
    %28 = vector.extract_strided_slice %22 {offsets = [16, 0], sizes = [24, 128], strides = [1, 1]} : vector<40x128xf32> to vector<24x128xf32>
    %29 = vector.extract_strided_slice %23 {offsets = [128, 0], sizes = [128, 256], strides = [1, 1]} : vector<256x256xf32> to vector<128x256xf32>
    %cst_21 = arith.constant dense<0.000000e+00> : vector<24x256xf32>
    %30 = tpu.matmul %28, %29, %cst_21 {dimension_numbers = #tpu.dot_dimension_numbers<[1], [0], [0], [1], [0, 0, 1, 1], [], []>} : vector<24x128xf32>, vector<128x256xf32>, vector<24x256xf32> -> vector<24x256xf32>
    %c16_22 = arith.constant 16 : index
    %c0_23 = arith.constant 0 : index
    %31 = vector.load %arg6[%c16_22, %c0_23] : memref<40x256xf32, #tpu.memory_space<vmem>>, vector<24x256xf32>
    tpu.vector_store %arg6[%c16_22, %c0_23], %30 {strides = array<i32>} : memref<40x256xf32, #tpu.memory_space<vmem>>, vector<24x256xf32>,
    %c0_24 = arith.constant 0 : index
    %c0_25 = arith.constant 0 : index
    %32 = vector.load %arg6[%c0_24, %c0_25] : memref<40x256xf32, #tpu.memory_space<vmem>>, vector<40x256xf32>
    %33 = vector.extract_strided_slice %32 {offsets = [0, 0], sizes = [40, 128], strides = [1, 1]} : vector<40x256xf32> to vector<40x128xf32>
    %34 = vector.extract_strided_slice %32 {offsets = [0, 128], sizes = [40, 128], strides = [1, 1]} : vector<40x256xf32> to vector<40x128xf32>
    %cst_26 = arith.constant dense<0.000000e+00> : vector<40x128xf32>
    %35 = tpu.matmul %0, %33, %cst_26 {dimension_numbers = #tpu.dot_dimension_numbers<[1], [0], [0], [1], [0, 0, 1, 1], [], []>} : vector<40x40xf32>, vector<40x128xf32>, vector<40x128xf32> -> vector<40x128xf32>
    %36 = arith.addf %35, %34 : vector<40x128xf32>
    %c0_27 = arith.constant 0 : index
    %c0_28 = arith.constant 0 : index
    %37 = vector.load %arg4[%c0_27, %c0_28] : memref<40x128xf32, #tpu.memory_space<vmem>>, vector<40x128xf32>
    tpu.vector_store %arg4[%c0_27, %c0_28], %36 {strides = array<i32>} : memref<40x128xf32, #tpu.memory_space<vmem>>, vector<40x128xf32>,
    return
  }
}

</mosaic_0001>

<bundles_post_ra>
// kernel: tpu_custom_call.1
= control target key start
LH: loop header
LB: loop body
LE: loop exit
PB: predicated region body
PF: predicated region fallthrough
CT: control target
= control target key end

     0   :  { %9 = vsyncpa [#allocation5], 0  ;;  %s1367_s0 = inlined_call_operand.hbm [shape: f32[40,40], index: 0, kind: input, shape index: {}]   ;;  %s1368_s1 = inlined_call_operand.hbm [shape: f32[40,128], index: 1, kind: input, shape index: {}]   ;;  %s1369_s2 = inlined_call_operand.hbm [shape: f32[256,256], index: 2, kind: input, shape index: {}]   ;;  %s1370_s3 = inlined_call_operand.hbm [shape: f32[256,256], index: 3, kind: input, shape index: {}]   ;;  %s1371_s4 = inlined_call_operand.hbm [shape: f32[40,128], index: 4, kind: output, shape index: {}]  }
   0x1   :  { %10 = vsyncpa [#allocation8], 0 }
   0x2   :  { %11 = vsyncpa [#allocation11], 0 }
   0x3   :  { %12 = vsyncpa [#allocation6], 0  ;;  %s1165_s15 = smov [#allocation7]   ;;  %s1166_s17 = smov [#allocation4]  }
   0x4   :  { %s30_s16 = sshll.u32 %s1165_s15, 4  ;;  %s18_s18 = sshll.u32 %s1166_s17, 4  ;;  %s31_s16 = int_to_ptr.vmem [resolvable:$true] %s30_s16  ;;  %s1202_s18 = int_to_ptr.vmem [resolvable:$true] %s18_s18 }
   0x5   :  { %s1047_s21 = scalar_lea.hbm %s1368_s1, 640 }
   0x6   :  { %p1048_p0 = scmp.ne.s32.totalorder %s1368_s1, %s1047_s21  ;;  %p1051_p1 = scmp.lt.u32.totalorder %s1047_s21, %s1368_s1 }
   0x8   :  { %p1053_p2 = pnand %p1051_p1, %p1048_p0 }
   0xa   :  { %1056 = shalt.err (!%p1053_p2)
}
   0xb   :  { %s1057_s26 = scalar_lea.vmem %s31_s16, 640  ;;  %p1062_p4 = scmp.lt.s32.totalorder %s31_s16, %s31_s16 }
   0xc   :  { %p1058_p3 = scmp.ne.s32.totalorder %s31_s16, %s1057_s26  ;;  %p1063_p5 = scmp.lt.s32.totalorder %s1057_s26, %s1057_s26 }
   0xe   :  { %p1064_p6 = por %p1063_p5, %p1062_p4 }
  0x10   :  { %p1065_p7 = pnand %p1064_p6, %p1058_p3 }
  0x12   :  { %1068 = shalt.err (!%p1065_p7)
}
  0x13   :  { %s1167_s27 = smov 128   ;;  %s1168_s28 = smov 8  }
  0x14   :  { %36 = dma.hbm_to_vmem [thread:$0]  %s1368_s1, 640, %s31_s16, [#allocation8], %s1167_s27, %s1167_s27, %s1168_s28  }
  0x15   :  { %s1069_s7 = scalar_lea.hbm %s1367_s0, 640 }
  0x16   :  { %p1070_p8 = scmp.ne.s32.totalorder %s1367_s0, %s1069_s7  ;;  %p1073_p9 = scmp.lt.u32.totalorder %s1069_s7, %s1367_s0 }
  0x18   :  { %p1075_p10 = pnand %p1073_p9, %p1070_p8 }
  0x1a   :  { %1078 = shalt.err (!%p1075_p10)
}
  0x1b   :  { %s1079_s12 = scalar_lea.vmem %s1202_s18, 640  ;;  %p1084_p12 = scmp.lt.s32.totalorder %s1202_s18, %s1202_s18 }
  0x1c   :  { %p1080_p11 = scmp.ne.s32.totalorder %s1202_s18, %s1079_s12  ;;  %p1085_p13 = scmp.lt.s32.totalorder %s1079_s12, %s1079_s12 }
  0x1e   :  { %p1086_p0 = por %p1085_p13, %p1084_p12 }
  0x20   :  { %p1087_p1 = pnand %p1086_p0, %p1080_p11 }
  0x22   :  { %1090 = shalt.err (!%p1087_p1)
}
  0x23   :  { %24 = dma.hbm_to_vmem [thread:$0]  %s1367_s0, 640, %s1202_s18, [#allocation5], %s1167_s27, %s1167_s27, %s1168_s28  }
  0x24   :  { %s1169_s14 = smov [#allocation9]   ;;  %s1091_s19 = scalar_lea.hbm %s1369_s2, 8192 }
  0x25   :  { %s42_s15 = sshll.u32 %s1169_s14, 4  ;;  %p1092_p2 = scmp.ne.s32.totalorder %s1369_s2, %s1091_s19  ;;  %s43_s15 = int_to_ptr.vmem [resolvable:$true] %s42_s15 }
  0x26   :  { %p1095_p3 = scmp.lt.u32.totalorder %s1091_s19, %s1369_s2 }
  0x28   :  { %p1097_p4 = pnand %p1095_p3, %p1092_p2 }
  0x2a   :  { %1100 = shalt.err (!%p1097_p4)
}
  0x2b   :  { %s1101_s24 = scalar_lea.vmem %s43_s15, 8192  ;;  %p1106_p6 = scmp.lt.s32.totalorder %s43_s15, %s43_s15 }
  0x2c   :  { %p1102_p5 = scmp.ne.s32.totalorder %s43_s15, %s1101_s24  ;;  %p1107_p7 = scmp.lt.s32.totalorder %s1101_s24, %s1101_s24 }
  0x2e   :  { %p1108_p8 = por %p1107_p7, %p1106_p6 }
  0x30   :  { %p1109_p9 = pnand %p1108_p8, %p1102_p5 }
  0x32   :  { %1112 = shalt.err (!%p1109_p9)
}
  0x33   :  { %s1170_s0 = smov 256   ;;  %s1171_s18 = smov 16  }
  0x34   :  { %48 = dma.hbm_to_vmem [thread:$0]  %s1369_s2, 8192, %s43_s15, [#allocation8], %s1170_s0, %s1170_s0, %s1171_s18  }
  0x35   :  { %s1172_s29 = smov [#allocation10]   ;;  %s1113_s7 = scalar_lea.hbm %s1370_s3, 8192 }
  0x36   :  { %s54_s30 = sshll.u32 %s1172_s29, 4  ;;  %p1114_p10 = scmp.ne.s32.totalorder %s1370_s3, %s1113_s7  ;;  %s55_s30 = int_to_ptr.vmem [resolvable:$true] %s54_s30 }
  0x37   :  { %p1117_p11 = scmp.lt.u32.totalorder %s1113_s7, %s1370_s3 }
  0x39   :  { %p1119_p12 = pnand %p1117_p11, %p1114_p10 }
  0x3b   :  { %1122 = shalt.err (!%p1119_p12)
}
  0x3c   :  { %s1123_s12 = scalar_lea.vmem %s55_s30, 8192  ;;  %p1128_p0 = scmp.lt.s32.totalorder %s55_s30, %s55_s30 }
  0x3d   :  { %p1124_p13 = scmp.ne.s32.totalorder %s55_s30, %s1123_s12  ;;  %p1129_p1 = scmp.lt.s32.totalorder %s1123_s12, %s1123_s12 }
  0x3f   :  { %p1130_p2 = por %p1129_p1, %p1128_p0 }
  0x41   :  { %p1131_p3 = pnand %p1130_p2, %p1124_p13 }
  0x43   :  { %1134 = shalt.err (!%p1131_p3)
}
  0x44   :  { %60 = dma.hbm_to_vmem [thread:$0]  %s1370_s3, 8192, %s55_s30, [#allocation11], %s1170_s0, %s1170_s0, %s1171_s18  }
  0x45   :  { %1157 = dma.done.wait [#allocation5], 640  }
  0x46   :  { %1158 = vsyncadd [#allocation5], 4294966656 }
  0x47   :  { %1159 = dma.done.wait [#allocation8], 8832  }
  0x48   :  { %1160 = vsyncadd [#allocation8], 4294958464 }
  0x49   :  { %1161 = dma.done.wait [#allocation11], 8192  }
  0x4a   :  { %1162 = vsyncadd [#allocation11], 4294959104  ;;  %v1173_v0 = vmov 0.0   ;;  %v79_v1 = vld [vmem:[#allocation9 + $0x8] sm:$0xff]  ;;  %v81_v2 = vld [vmem:[#allocation9 + $0x18] sm:$0xff]  ;;  %vm1175_vm0 = vmmov 0  }
  0x4b   :  { %208 = vmatprep.mubr.f32.mxu0 %v1173_v0  ;;  %292 = vmatprep.mubr.f32.mxu1 %v1173_v0  ;;  %v111_v3 = vld [vmem:[#allocation9 + $0x108] sm:$0xff]  ;;  %v889_v4 = vpack.c.bf16 %v81_v2, %v79_v1  ;;  %v113_v5 = vld [vmem:[#allocation9 + $0x118] sm:$0xff]  ;;  %v78_v6 = vld [vmem:[#allocation9] sm:$0xff]  ;;  %vm327_vm1 = vcmask 326656   ;;  %s1176_s3 = smov [#allocation12]  }
  0x4c   :  { %v80_v7 = vld [vmem:[#allocation9 + $0x10] sm:$0xff]  ;;  %v921_v8 = vpack.c.bf16 %v113_v5, %v111_v3  ;;  %v110_v10 = vld [vmem:[#allocation9 + $0x100] sm:$0xff]  ;;  %v83_v12 = vld [vmem:[#allocation9 + $0x28] sm:$0xff]  ;;  %s795_s13 = sshll.u32 %s1176_s3, 4  ;;  %s796_s13 = int_to_ptr.vmem [resolvable:$true] %s795_s13 }
  0x4d   :  { %v891_v9 = vpack.c.bf16 %v80_v7, %v78_v6  ;;  %v112_v11 = vld [vmem:[#allocation9 + $0x110] sm:$0xff]  ;;  %890 = vmatprep.subr.bf16.mxu0 %v889_v4  ;;  %v85_v14 = vld [vmem:[#allocation9 + $0x38] sm:$0xff]  ;;  %v115_v15 = vld [vmem:[#allocation9 + $0x128] sm:$0xff]  ;;  %s1135_s14 = scalar_lea.vmem %s796_s13, 640  ;;  %p1140_p5 = scmp.lt.s32.totalorder %s796_s13, %s796_s13 }
  0x4e   :  { %v923_v13 = vpack.c.bf16 %v112_v11, %v110_v10  ;;  %v117_v16 = vld [vmem:[#allocation9 + $0x138] sm:$0xff]  ;;  %922 = vmatprep.subr.bf16.mxu1 %v921_v8  ;;  %v893_v17 = vpack.c.bf16 %v85_v14, %v83_v12  ;;  %v82_v19 = vld [vmem:[#allocation9 + $0x20] sm:$0xff]  ;;  %v84_v20 = vld [vmem:[#allocation9 + $0x30] sm:$0xff]  ;;  %p1136_p4 = scmp.ne.s32.totalorder %s796_s13, %s1135_s14  ;;  %p1141_p6 = scmp.lt.s32.totalorder %s1135_s14, %s1135_s14 }
  0x4f   :  { %892 = vmatpush1.bf16.msra.mxu0 %v891_v9  ;;  %v925_v18 = vpack.c.bf16 %v117_v16, %v115_v15  ;;  %v114_v21 = vld [vmem:[#allocation9 + $0x120] sm:$0xff]  ;;  %v895_v22 = vpack.c.bf16 %v84_v20, %v82_v19  ;;  %v116_v23 = vld [vmem:[#allocation9 + $0x130] sm:$0xff]  ;;  %v87_v24 = vld [vmem:[#allocation9 + $0x48] sm:$0xff] }
  0x50   :  { %924 = vmatpush1.bf16.msra.mxu1 %v923_v13  ;;  %v89_v25 = vld [vmem:[#allocation9 + $0x58] sm:$0xff]  ;;  %894 = vmatprep.subr.bf16.mxu0 %v893_v17  ;;  %v927_v26 = vpack.c.bf16 %v116_v23, %v114_v21  ;;  %v119_v28 = vld [vmem:[#allocation9 + $0x148] sm:$0xff]  ;;  %v86_v30 = vld [vmem:[#allocation9 + $0x40] sm:$0xff]  ;;  %p1142_p7 = por %p1141_p6, %p1140_p5 }
  0x51   :  { %926 = vmatprep.subr.bf16.mxu1 %v925_v18  ;;  %v897_v27 = vpack.c.bf16 %v89_v25, %v87_v24  ;;  %v121_v29 = vld [vmem:[#allocation9 + $0x158] sm:$0xff]  ;;  %v88_v32 = vld [vmem:[#allocation9 + $0x50] sm:$0xff]  ;;  %v118_v33 = vld [vmem:[#allocation9 + $0x140] sm:$0xff] }
  0x52   :  { %v929_v31 = vpack.c.bf16 %v121_v29, %v119_v28  ;;  %v120_v34 = vld [vmem:[#allocation9 + $0x150] sm:$0xff]  ;;  %v899_v35 = vpack.c.bf16 %v88_v32, %v86_v30  ;;  %v91_v36 = vld [vmem:[#allocation9 + $0x68] sm:$0xff]  ;;  %v93_v37 = vld [vmem:[#allocation9 + $0x78] sm:$0xff]  ;;  %p1143_p8 = pnand %p1142_p7, %p1136_p4 }
  0x53   :  { %896 = vmatpush1.bf16.msra.mxu0 %v895_v22  ;;  %v123_v38 = vld [vmem:[#allocation9 + $0x168] sm:$0xff]  ;;  %v931_v39 = vpack.c.bf16 %v120_v34, %v118_v33  ;;  %v901_v40 = vpack.c.bf16 %v93_v37, %v91_v36  ;;  %v125_v41 = vld [vmem:[#allocation9 + $0x178] sm:$0xff]  ;;  %v90_v42 = vld [vmem:[#allocation9 + $0x60] sm:$0xff] }
  0x54   :  { %928 = vmatpush1.bf16.msra.mxu1 %v927_v26  ;;  %898 = vmatprep.subr.bf16.mxu0 %v897_v27  ;;  %v92_v43 = vld [vmem:[#allocation9 + $0x70] sm:$0xff]  ;;  %v933_v44 = vpack.c.bf16 %v125_v41, %v123_v38  ;;  %v122_v45 = vld [vmem:[#allocation9 + $0x160] sm:$0xff]  ;;  %v95_v47 = vld [vmem:[#allocation9 + $0x88] sm:$0xff] }
  0x55   :  { %930 = vmatprep.subr.bf16.mxu1 %v929_v31  ;;  %v124_v46 = vld [vmem:[#allocation9 + $0x170] sm:$0xff]  ;;  %v97_v48 = vld [vmem:[#allocation9 + $0x98] sm:$0xff]  ;;  %v127_v49 = vld [vmem:[#allocation9 + $0x188] sm:$0xff]  ;;  %v903_v51 = vpack.c.bf16 %v92_v43, %v90_v42 }
  0x56   :  { %v129_v50 = vld [vmem:[#allocation9 + $0x198] sm:$0xff]  ;;  %v935_v52 = vpack.c.bf16 %v124_v46, %v122_v45  ;;  %v905_v53 = vpack.c.bf16 %v97_v48, %v95_v47  ;;  %v94_v54 = vld [vmem:[#allocation9 + $0x80] sm:$0xff]  ;;  %v96_v55 = vld [vmem:[#allocation9 + $0x90] sm:$0xff] }
  0x57   :  { %900 = vmatpush1.bf16.msra.mxu0 %v899_v35  ;;  %v126_v56 = vld [vmem:[#allocation9 + $0x180] sm:$0xff]  ;;  %v937_v57 = vpack.c.bf16 %v129_v50, %v127_v49  ;;  %v128_v58 = vld [vmem:[#allocation9 + $0x190] sm:$0xff]  ;;  %v99_v59 = vld [vmem:[#allocation9 + $0xa8] sm:$0xff]  ;;  %v907_v63 = vpack.c.bf16 %v96_v55, %v94_v54 }
  0x58   :  { %932 = vmatpush1.bf16.msra.mxu1 %v931_v39  ;;  %902 = vmatprep.subr.bf16.mxu0 %v901_v40  ;;  %v101_v60 = vld [vmem:[#allocation9 + $0xb8] sm:$0xff]  ;;  %v131_v61 = vld [vmem:[#allocation9 + $0x1a8] sm:$0xff]  ;;  %v939_v1 = vpack.c.bf16 %v128_v58, %v126_v56  ;;  %v98_v3 = vld [vmem:[#allocation9 + $0xa0] sm:$0xff]  ;;  %v1174_v39 = vmov 0.0|0.0  }
  0x59   :  { %934 = vmatprep.subr.bf16.mxu1 %v933_v44  ;;  %v133_v62 = vld [vmem:[#allocation9 + $0x1b8] sm:$0xff]  ;;  %v909_v2 = vpack.c.bf16 %v101_v60, %v99_v59  ;;  %v100_v4 = vld [vmem:[#allocation9 + $0xb0] sm:$0xff]  ;;  %v130_v5 = vld [vmem:[#allocation9 + $0x1a0] sm:$0xff] }
  0x5a   :  { %v941_v6 = vpack.c.bf16 %v133_v62, %v131_v61  ;;  %v132_v7 = vld [vmem:[#allocation9 + $0x1b0] sm:$0xff]  ;;  %v103_v8 = vld [vmem:[#allocation9 + $0xc8] sm:$0xff]  ;;  %v105_v9 = vld [vmem:[#allocation9 + $0xd8] sm:$0xff]  ;;  %v911_v12 = vpack.c.bf16 %v100_v4, %v98_v3 }
  0x5b   :  { %904 = vmatpush1.bf16.msra.mxu0 %v903_v51  ;;  %v135_v10 = vld [vmem:[#allocation9 + $0x1c8] sm:$0xff]  ;;  %v137_v11 = vld [vmem:[#allocation9 + $0x1d8] sm:$0xff]  ;;  %v943_v13 = vpack.c.bf16 %v132_v7, %v130_v5  ;;  %v913_v14 = vpack.c.bf16 %v105_v9, %v103_v8  ;;  %v102_v15 = vld [vmem:[#allocation9 + $0xc0] sm:$0xff] }
  0x5c   :  { %936 = vmatpush1.bf16.msra.mxu1 %v935_v52  ;;  %906 = vmatprep.subr.bf16.mxu0 %v905_v53  ;;  %v104_v16 = vld [vmem:[#allocation9 + $0xd0] sm:$0xff]  ;;  %v134_v17 = vld [vmem:[#allocation9 + $0x1c0] sm:$0xff]  ;;  %v945_v18 = vpack.c.bf16 %v137_v11, %v135_v10  ;;  %v107_v20 = vld [vmem:[#allocation9 + $0xe8] sm:$0xff] }
  0x5d   :  { %938 = vmatprep.subr.bf16.mxu1 %v937_v57  ;;  %v136_v19 = vld [vmem:[#allocation9 + $0x1d0] sm:$0xff]  ;;  %v109_v21 = vld [vmem:[#allocation9 + $0xf8] sm:$0xff]  ;;  %v139_v22 = vld [vmem:[#allocation9 + $0x1e8] sm:$0xff]  ;;  %v915_v24 = vpack.c.bf16 %v104_v16, %v102_v15 }
  0x5e   :  { %v141_v23 = vld [vmem:[#allocation9 + $0x1f8] sm:$0xff]  ;;  %v947_v25 = vpack.c.bf16 %v136_v19, %v134_v17  ;;  %v917_v26 = vpack.c.bf16 %v109_v21, %v107_v20  ;;  %v106_v27 = vld [vmem:[#allocation9 + $0xe0] sm:$0xff]  ;;  %v108_v28 = vld [vmem:[#allocation9 + $0xf0] sm:$0xff] }
  0x5f   :  { %908 = vmatpush1.bf16.msra.mxu0 %v907_v63  ;;  %v949_v29 = vpack.c.bf16 %v141_v23, %v139_v22  ;;  %v138_v30 = vld [vmem:[#allocation9 + $0x1e0] sm:$0xff]  ;;  %v140_v31 = vld [vmem:[#allocation9 + $0x1f0] sm:$0xff]  ;;  %v919_v32 = vpack.c.bf16 %v108_v28, %v106_v27  ;;  %v142_v34 = vld [vmem:[#allocation7] sm:$0xff] }
  0x60   :  { %940 = vmatpush1.bf16.msra.mxu1 %v939_v1  ;;  %910 = vmatprep.subr.bf16.mxu0 %v909_v2  ;;  %v951_v33 = vpack.c.bf16 %v140_v31, %v138_v30  ;;  %v225_v35 = vld [vmem:[#allocation7 + $0x10] sm:$0xff]  ;;  %v143_v36 = vld [vmem:[#allocation7 + $0x8] sm:$0xff]  ;;  %v226_v37 = vld [vmem:[#allocation7 + $0x18] sm:$0xff] }
  0x61   :  { %942 = vmatprep.subr.bf16.mxu1 %v941_v6  ;;  %v227_v38 = vld [vmem:[#allocation7 + $0x20] sm:$0xff]  ;;  %v452_v40 = vld [vmem:[#allocation10 + $0x8] sm:$0xff]  ;;  %v451_v42 = vld [vmem:[#allocation10] sm:$0xff] }
  0x62   :  { %v454_v41 = vld [vmem:[#allocation10 + $0x18] sm:$0xff]  ;;  %v453_v44 = vld [vmem:[#allocation10 + $0x10] sm:$0xff]  ;;  %v456_v45 = vld [vmem:[#allocation10 + $0x28] sm:$0xff] }
  0x63   :  { %912 = vmatpush1.bf16.msra.mxu0 %v911_v12  ;;  %v959_v43 = vpack.c.bf16 %v454_v41, %v452_v40  ;;  %v458_v46 = vld [vmem:[#allocation10 + $0x38] sm:$0xff]  ;;  %v961_v47 = vpack.c.bf16 %v453_v44, %v451_v42  ;;  %v455_v49 = vld [vmem:[#allocation10 + $0x20] sm:$0xff]  ;;  %v457_v50 = vld [vmem:[#allocation10 + $0x30] sm:$0xff] }
  0x64   :  { %944 = vmatpush1.bf16.msra.mxu1 %v943_v13  ;;  %914 = vmatprep.subr.bf16.mxu0 %v913_v14  ;;  %v963_v48 = vpack.c.bf16 %v458_v46, %v456_v45  ;;  %v460_v51 = vld [vmem:[#allocation10 + $0x48] sm:$0xff]  ;;  %v462_v52 = vld [vmem:[#allocation10 + $0x58] sm:$0xff]  ;;  %v965_v53 = vpack.c.bf16 %v457_v50, %v455_v49  ;;  %v459_v55 = vld [vmem:[#allocation10 + $0x40] sm:$0xff] }
  0x65   :  { %946 = vmatprep.subr.bf16.mxu1 %v945_v18  ;;  %v967_v54 = vpack.c.bf16 %v462_v52, %v460_v51  ;;  %v461_v56 = vld [vmem:[#allocation10 + $0x50] sm:$0xff]  ;;  %v464_v57 = vld [vmem:[#allocation10 + $0x68] sm:$0xff]  ;;  %v466_v58 = vld [vmem:[#allocation10 + $0x78] sm:$0xff] }
  0x66   :  { %v969_v59 = vpack.c.bf16 %v461_v56, %v459_v55  ;;  %v971_v60 = vpack.c.bf16 %v466_v58, %v464_v57  ;;  %v463_v61 = vld [vmem:[#allocation10 + $0x60] sm:$0xff]  ;;  %v465_v62 = vld [vmem:[#allocation10 + $0x70] sm:$0xff]  ;;  %v468_v63 = vld [vmem:[#allocation10 + $0x88] sm:$0xff] }
  0x67   :  { %916 = vmatpush1.bf16.msra.mxu0 %v915_v24  ;;  %v470_v1 = vld [vmem:[#allocation10 + $0x98] sm:$0xff]  ;;  %v973_v2 = vpack.c.bf16 %v465_v62, %v463_v61  ;;  %v467_v4 = vld [vmem:[#allocation10 + $0x80] sm:$0xff]  ;;  %v469_v5 = vld [vmem:[#allocation10 + $0x90] sm:$0xff] }
  0x68   :  { %948 = vmatpush1.bf16.msra.mxu1 %v947_v25  ;;  %918 = vmatprep.subr.bf16.mxu0 %v917_v26  ;;  %v975_v3 = vpack.c.bf16 %v470_v1, %v468_v63  ;;  %v472_v6 = vld [vmem:[#allocation10 + $0xa8] sm:$0xff]  ;;  %v474_v7 = vld [vmem:[#allocation10 + $0xb8] sm:$0xff]  ;;  %v977_v8 = vpack.c.bf16 %v469_v5, %v467_v4  ;;  %v471_v10 = vld [vmem:[#allocation10 + $0xa0] sm:$0xff] }
  0x69   :  { %950 = vmatprep.subr.bf16.mxu1 %v949_v29  ;;  %v979_v9 = vpack.c.bf16 %v474_v7, %v472_v6  ;;  %v473_v11 = vld [vmem:[#allocation10 + $0xb0] sm:$0xff]  ;;  %v484_v24 = vld [vmem:[#allocation10 + $0x108] sm:$0xff]  ;;  %v486_v25 = vld [vmem:[#allocation10 + $0x118] sm:$0xff] }
  0x6a   :  { %v981_v12 = vpack.c.bf16 %v473_v11, %v471_v10  ;;  %v483_v27 = vld [vmem:[#allocation10 + $0x100] sm:$0xff]  ;;  %v485_v28 = vld [vmem:[#allocation10 + $0x110] sm:$0xff]  ;;  %v488_v29 = vld [vmem:[#allocation10 + $0x128] sm:$0xff]  ;;  %v991_v31 = vpack.c.bf16 %v486_v25, %v484_v24 }
  0x6b   :  { %920 = vmatpush1.bf16.msra.mxu0 %v919_v32  ;;  %v490_v30 = vld [vmem:[#allocation10 + $0x138] sm:$0xff]  ;;  %v1284_v32 = vld [vmem:[#allocation4] sm:$0xff]  ;;  %v496_v45 = vld [vmem:[#allocation10 + $0x168] sm:$0xff] }
  0x6c   :  { %952 = vmatpush1.bf16.msra.mxu1 %v951_v33  ;;  %953 = vmatprep.subr.bf16.mxu0 %v1174_v39  ;;  %v993_v33 = vpack.c.bf16 %v485_v28, %v483_v27  ;;  %v1290_v40 = vld [vmem:[#allocation4 + $0x8] sm:$0xff]  ;;  %v493_v44 = vld [vmem:[#allocation10 + $0x150] sm:$0xff]  ;;  %v495_v50 = vld [vmem:[#allocation10 + $0x160] sm:$0xff] }
  0x6d   :  { %960 = vmatprep.subr.bf16.mxu1 %v959_v43  ;;  %v491_v43 = vld [vmem:[#allocation10 + $0x140] sm:$0xff]  ;;  %v498_v46 = vld [vmem:[#allocation10 + $0x178] sm:$0xff]  ;;  %v497_v51 = vld [vmem:[#allocation10 + $0x170] sm:$0xff] }
  0x6e   :  { %209 = vmatmul.mubr.f32.vlgmr.msra.gmra.mrb[0].mxu0 %v142_v34  ;;  %v995_v34 = vpack.c.bf16 %v490_v30, %v488_v29  ;;  %v1003_v49 = vpack.c.bf16 %v498_v46, %v496_v45  ;;  %v1302_v52 = vld [vmem:[#allocation4 + $0x18] sm:$0xff]  ;;  %v478_v56 = vld [vmem:[#allocation10 + $0xd8] sm:$0xff]  ;;  %v477_v61 = vld [vmem:[#allocation10 + $0xd0] sm:$0xff] }
  0x6f   :  { %293 = vmatmul.mubr.f32.vlgmr.msra.gmra.mrb[0].mxu1 %v225_v35  ;;  %214 = vmatprep.mubr.f32.mxu0 %v1173_v0  ;;  %v487_v35 = vld [vmem:[#allocation10 + $0x120] sm:$0xff]  ;;  %v476_v55 = vld [vmem:[#allocation10 + $0xc8] sm:$0xff]  ;;  %v482_v5 = vld [vmem:[#allocation10 + $0xf8] sm:$0xff] }
  0x70   :  { %298 = vmatprep.mubr.f32.mxu1 %v1173_v0  ;;  %962 = vmatpush1.bf16.msra.mxu1 %v961_v47  ;;  %v1296_v47 = vld [vmem:[#allocation4 + $0x10] sm:$0xff]  ;;  %v500_v57 = vld [vmem:[#allocation10 + $0x188] sm:$0xff]  ;;  %v983_v58 = vpack.c.bf16 %v478_v56, %v476_v55  ;;  %v481_v10 = vld [vmem:[#allocation10 + $0xf0] sm:$0xff] }
  0x71   :  { %964 = vmatprep.subr.bf16.mxu1 %v963_v48  ;;  %v1001_v48 = vpack.c.bf16 %v493_v44, %v491_v43  ;;  %v499_v1 = vld [vmem:[#allocation10 + $0x180] sm:$0xff]  ;;  %v480_v4 = vld [vmem:[#allocation10 + $0xe8] sm:$0xff]  ;;  %v509_v24 = vld [vmem:[#allocation10 + $0x1d0] sm:$0xff] }
  0x72   :  { %215 = vmatmul.mubr.f32.gmra.mrb[2].mxu0 %v143_v36  ;;  %v489_v36 = vld [vmem:[#allocation10 + $0x130] sm:$0xff]  ;;  %v504_v6 = vld [vmem:[#allocation10 + $0x1a8] sm:$0xff]  ;;  %v987_v7 = vpack.c.bf16 %v482_v5, %v480_v4  ;;  %v514_v28 = vld [vmem:[#allocation10 + $0x1f8] sm:$0xff] }
  0x73   :  { %299 = vmatmul.mubr.f32.gmra.mrb[2].mxu1 %v226_v37  ;;  %849 = vmatprep.mubr.msk.f32.mxu0 %vm1175_vm0, %v1173_v0  ;;  %v492_v37 = vld [vmem:[#allocation10 + $0x148] sm:$0xff]  ;;  %v997_v41 = vpack.c.bf16 %v489_v36, %v487_v35  ;;  %v511_v30 = vld [vmem:[#allocation10 + $0x1e0] sm:$0xff] }
  0x74   :  { %304 = vmatprep.mubr.f32.mxu1 %v1173_v0  ;;  %966 = vmatpush1.bf16.msra.mxu1 %v965_v53  ;;  %v1005_v53 = vpack.c.bf16 %v497_v51, %v495_v50  ;;  %v512_v27 = vld [vmem:[#allocation10 + $0x1e8] sm:$0xff] }
  0x75   :  { %968 = vmatprep.subr.bf16.mxu1 %v967_v54  ;;  %v1308_v54 = vld [vmem:[#allocation4 + $0x20] sm:$0xff]  ;;  %v1019_v29 = vpack.c.bf16 %v514_v28, %v512_v27 }
  0x77   :  { %305 = vmatmul.mubr.f32.gmra.mrb[4].mxu1 %v227_v38  ;;  %v494_v38 = vld [vmem:[#allocation10 + $0x158] sm:$0xff] }
  0x78   :  { %579 = vmatprep.mubr.f32.mxu1 %v1173_v0  ;;  %970 = vmatpush1.bf16.msra.mxu1 %v969_v59  ;;  %v999_v42 = vpack.c.bf16 %v494_v38, %v492_v37  ;;  %v502_v59 = vld [vmem:[#allocation10 + $0x198] sm:$0xff] }
  0x79   :  { %972 = vmatprep.subr.bf16.mxu1 %v971_v60  ;;  %v475_v60 = vld [vmem:[#allocation10 + $0xc0] sm:$0xff]  ;;  %v1007_v62 = vpack.c.bf16 %v502_v59, %v500_v57 }
  0x7a   :  { %v985_v63 = vpack.c.bf16 %v477_v61, %v475_v60 }
  0x7c   :  { %974 = vmatpush1.bf16.msra.mxu1 %v973_v2  ;;  %v501_v2 = vld [vmem:[#allocation10 + $0x190] sm:$0xff] }
  0x7d   :  { %976 = vmatprep.subr.bf16.mxu1 %v975_v3  ;;  %v1009_v3 = vpack.c.bf16 %v501_v2, %v499_v1 }
  0x80   :  { %978 = vmatpush1.bf16.msra.mxu1 %v977_v8  ;;  %v506_v8 = vld [vmem:[#allocation10 + $0x1b8] sm:$0xff] }
  0x81   :  { %980 = vmatprep.subr.bf16.mxu1 %v979_v9  ;;  %v479_v9 = vld [vmem:[#allocation10 + $0xe0] sm:$0xff]  ;;  %v1011_v11 = vpack.c.bf16 %v506_v8, %v504_v6 }
  0x84   :  { %982 = vmatpush1.bf16.msra.mxu1 %v981_v12  ;;  %v989_v12 = vpack.c.bf16 %v481_v10, %v479_v9 }
  0x85   :  { %984 = vmatprep.subr.bf16.mxu1 %v983_v58 }
  0x88   :  { %986 = vmatpush1.bf16.msra.mxu1 %v985_v63 }
  0x89   :  { %988 = vmatprep.subr.bf16.mxu1 %v987_v7 }
  0x8c   :  { %990 = vmatpush1.bf16.msra.mxu1 %v989_v12 }
  0x8d   :  { %1029 = vmatprep.subr.bf16.mxu1 %v1174_v39 }
 0x141   :  { %v210_v13 = vpop.f32.mrb[0].mxu0 }
 0x142   :  { %v1272_v14 = vpop.f32.mrb[1].mxu0  ;;  %v294_v15 = vpop.f32.mrb[0].mxu1 }
 0x143   :  { %v1274_v16 = vpop.f32.mrb[1].mxu1 }
 0x145   :  { %v216_v17 = vpop.f32.mrb[2].mxu0 }
 0x146   :  { %v954_v18 = vpack.c.bf16 %v216_v17, %v210_v13  ;;  %v300_v19 = vpop.f32.mrb[2].mxu1  ;;  %v1276_v20 = vpop.f32.mrb[3].mxu0  ;;  %v503_v13 = vld [vmem:[#allocation10 + $0x1a0] sm:$0xff] }
 0x147   :  { %v957_v21 = vpack.c.bf16 %v300_v19, %v294_v15  ;;  %v1278_v22 = vpop.f32.mrb[3].mxu1  ;;  %v505_v15 = vld [vmem:[#allocation10 + $0x1b0] sm:$0xff]  ;;  %v510_v19 = vld [vmem:[#allocation10 + $0x1d8] sm:$0xff] }
 0x148   :  { %955 = vmatpush3.bf16.msra.mxu0 %v954_v18  ;;  %v1013_v17 = vpack.c.bf16 %v505_v15, %v503_v13  ;;  %v508_v18 = vld [vmem:[#allocation10 + $0x1c8] sm:$0xff] }
 0x149   :  { %956 = vmatprep.subr.bf16.mxu0 %v1174_v39 }
 0x14a   :  { %v306_v23 = vpop.f32.mrb[4].mxu1 }
 0x14b   :  { %v1281_v26 = vpop.f32.mrb[5].mxu1 }
 0x14c   :  { %958 = vmatpush3.bf16.msra.mxu0 %v957_v21  ;;  %v1015_v21 = vpack.c.bf16 %v510_v19, %v508_v18 }
 0x14d   :  { %847 = vmatprep.subr.mxu0 %v1173_v0 }
 0x150   :  { %848 = vmatpush3.msra.mxu0 %v306_v23  ;;  %v507_v23 = vld [vmem:[#allocation10 + $0x1c0] sm:$0xff] }
 0x151   :  { %850 = vmatmul.mubr.msk.f32.vlgmr.msra.gmra.mrb[4].mxu0 %vm327_vm1, %v1284_v32  ;;  %992 = vmatprep.subr.bf16.mxu0 %v991_v31  ;;  %v1017_v25 = vpack.c.bf16 %v509_v24, %v507_v23  ;;  %v513_v31 = vld [vmem:[#allocation10 + $0x1f0] sm:$0xff] }
 0x152   :  { %852 = vmatprep.mubr.msk.f32.mxu0 %vm1175_vm0, %v1173_v0  ;;  %994 = vmatpush1.bf16.msra.mxu0 %v993_v33  ;;  %v1021_v33 = vpack.c.bf16 %v513_v31, %v511_v30 }
 0x153   :  { %996 = vmatprep.subr.bf16.mxu0 %v995_v34  ;;  %v443_v34 = vlaneseq }
 0x155   :  { %853 = vmatmul.mubr.msk.f32.gmra.mrb[6].mxu0 %vm327_vm1, %v1290_v40  ;;  %v444_v36 = vand.u32 127, %v443_v34 }
 0x156   :  { %855 = vmatprep.mubr.msk.f32.mxu0 %vm1175_vm0, %v1173_v0  ;;  %998 = vmatpush1.bf16.msra.mxu0 %v997_v41 }
 0x157   :  { %1000 = vmatprep.subr.bf16.mxu0 %v999_v42  ;;  %vm445_vm2 = vcmp.eq.s32.totalorder %v444_v36, 32 }
 0x159   :  { %856 = vmatmul.mubr.msk.f32.gmra.mrb[8].mxu0 %vm327_vm1, %v1296_v47 }
 0x15a   :  { %858 = vmatprep.mubr.msk.f32.mxu0 %vm1175_vm0, %v1173_v0  ;;  %1002 = vmatpush1.bf16.msra.mxu0 %v1001_v48 }
 0x15b   :  { %1004 = vmatprep.subr.bf16.mxu0 %v1003_v49 }
 0x15d   :  { %859 = vmatmul.mubr.msk.f32.gmra.mrb[10].mxu0 %vm327_vm1, %v1302_v52 }
 0x15e   :  { %861 = vmatprep.mubr.msk.f32.mxu0 %vm1175_vm0, %v1173_v0  ;;  %1006 = vmatpush1.bf16.msra.mxu0 %v1005_v53 }
 0x15f   :  { %1008 = vmatprep.subr.bf16.mxu0 %v1007_v62 }
 0x161   :  { %862 = vmatmul.mubr.msk.f32.gmra.mrb[12].mxu0 %vm327_vm1, %v1308_v54 }
 0x162   :  { %660 = vmatprep.mubr.f32.mxu0 %v1173_v0  ;;  %1010 = vmatpush1.bf16.msra.mxu0 %v1009_v3 }
 0x163   :  { %1012 = vmatprep.subr.bf16.mxu0 %v1011_v11 }
 0x166   :  { %1014 = vmatpush1.bf16.msra.mxu0 %v1013_v17 }
 0x167   :  { %1016 = vmatprep.subr.bf16.mxu0 %v1015_v21 }
 0x16a   :  { %1018 = vmatpush1.bf16.msra.mxu0 %v1017_v25 }
 0x16b   :  { %1020 = vmatprep.subr.bf16.mxu0 %v1019_v29 }
 0x16e   :  { %1022 = vmatpush1.bf16.msra.mxu0 %v1021_v33 }
 0x16f   :  { %1023 = vmatprep.subr.bf16.mxu0 %v1174_v39 }
 0x224   :  { %v409_v35 = vpop.f32.mrb[4].mxu0 }
 0x225   :  { %v410_v37 = vadd.f32 %v409_v35, %v1272_v14  ;;  %v851_v38 = vpop.f32.mrb[5].mxu0 }
 0x227   :  { %v433_v41 = vmul.f32 0.01, %v410_v37 }
 0x228   :  { %v414_v42 = vpop.f32.mrb[6].mxu0 }
 0x229   :  { %v438_v43 = vmax.f32 %v410_v37, %v433_v41  ;;  %v415_v44 = vadd.f32 %v414_v42, %v1276_v20  ;;  %v854_v45 = vpop.f32.mrb[7].mxu0 }
 0x22b   :  { %v446_v46 = vsel %vm445_vm2, 1.0, %v438_v43  ;;  %v434_v48 = vmul.f32 0.01, %v415_v44 }
 0x22c   :  { %v419_v49 = vpop.f32.mrb[8].mxu0  ;;  %580 = vmatmul.mubr.f32.vlgmr.msra.gmra.mrb[6].mxu1 %v446_v46 }
 0x22d   :  { %v439_v50 = vmax.f32 %v415_v44, %v434_v48  ;;  %v420_v51 = vadd.f32 %v419_v49, %v1274_v16  ;;  %v857_v53 = vpop.f32.mrb[9].mxu0  ;;  %585 = vmatprep.mubr.f32.mxu1 %v1173_v0 }
 0x22f   :  { %v435_v14 = vmul.f32 0.01, %v420_v51  ;;  %v447_v55 = vsel %vm445_vm2, 1.0, %v439_v50 }
 0x230   :  { %v424_v56 = vpop.f32.mrb[10].mxu0  ;;  %586 = vmatmul.mubr.f32.gmra.mrb[8].mxu1 %v447_v55 }
 0x231   :  { %v440_v57 = vmax.f32 %v420_v51, %v435_v14  ;;  %v425_v20 = vadd.f32 %v424_v56, %v1278_v22  ;;  %v860_v58 = vpop.f32.mrb[11].mxu0  ;;  %877 = vmatprep.mubr.msk.f32.mxu1 %vm1175_vm0, %v1173_v0 }
 0x233   :  { %v448_v59 = vsel %vm445_vm2, 1.0, %v440_v57  ;;  %v436_v60 = vmul.f32 0.01, %v425_v20 }
 0x234   :  { %v429_v61 = vpop.f32.mrb[12].mxu0  ;;  %661 = vmatmul.mubr.f32.vlgmr.msra.gmra.mrb[14].mxu0 %v448_v59 }
 0x235   :  { %v441_v16 = vmax.f32 %v425_v20, %v436_v60  ;;  %v430_v62 = vadd.f32 %v429_v61, %v1281_v26  ;;  %v863_v63 = vpop.f32.mrb[13].mxu0  ;;  %666 = vmatprep.mubr.f32.mxu0 %v1173_v0 }
 0x237   :  { %v437_v1 = vmul.f32 0.01, %v430_v62  ;;  %v449_v2 = vsel %vm445_vm2, 1.0, %v441_v16 }
 0x238   :  { %667 = vmatmul.mubr.f32.gmra.mrb[16].mxu0 %v449_v2 }
 0x239   :  { %v442_v22 = vmax.f32 %v430_v62, %v437_v1  ;;  %672 = vmatprep.mubr.f32.mxu0 %v1173_v0 }
 0x23b   :  { %v450_v3 = vsel %vm445_vm2, 1.0, %v442_v22 }
 0x23c   :  { %673 = vmatmul.mubr.f32.gmra.mrb[18].mxu0 %v450_v3 }
 0x23d   :  { %874 = vmatprep.mubr.msk.f32.mxu0 %vm1175_vm0, %v1173_v0 }
 0x2ff   :  { %v581_v4 = vpop.f32.mrb[6].mxu1 }
 0x300   :  { %v583_v5 = vpop.f32.mrb[7].mxu1 }
 0x303   :  { %v587_v6 = vpop.f32.mrb[8].mxu1 }
 0x304   :  { %v1024_v26 = vpack.c.bf16 %v587_v6, %v581_v4  ;;  %v589_v7 = vpop.f32.mrb[9].mxu1 }
 0x306   :  { %1025 = vmatpush3.bf16.msra.mxu0 %v1024_v26  ;;  %1032 = vmatpush3.bf16.msra.mxu1 %v1024_v26 }
 0x307   :  { %v662_v8 = vpop.f32.mrb[14].mxu0  ;;  %1026 = vmatprep.subr.bf16.mxu0 %v1174_v39  ;;  %1030 = vmatprep.subr.bf16.mxu1 %v1174_v39 }
 0x308   :  { %v664_v9 = vpop.f32.mrb[15].mxu0 }
 0x30b   :  { %v668_v10 = vpop.f32.mrb[16].mxu0 }
 0x30c   :  { %v1027_v11 = vpack.c.bf16 %v668_v10, %v662_v8  ;;  %v670_v12 = vpop.f32.mrb[17].mxu0 }
 0x30e   :  { %1028 = vmatpush3.bf16.msra.mxu0 %v1027_v11  ;;  %1033 = vmatpush3.bf16.msra.mxu1 %v1027_v11 }
 0x30f   :  { %v674_v13 = vpop.f32.mrb[18].mxu0  ;;  %872 = vmatprep.subr.mxu0 %v1173_v0  ;;  %1031 = vmatprep.subr.mxu1 %v1173_v0 }
 0x310   :  { %v676_v15 = vpop.f32.mrb[19].mxu0 }
 0x312   :  { %873 = vmatpush3.msra.mxu0 %v674_v13  ;;  %1034 = vmatpush3.msra.mxu1 %v674_v13 }
 0x313   :  { %875 = vmatmul.mubr.msk.f32.vlgmr.msra.gmra.mrb[20].mxu0 %vm327_vm1, %v1284_v32  ;;  %878 = vmatmul.mubr.msk.f32.vlgmr.msra.gmra.mrb[10].mxu1 %vm327_vm1, %v1290_v40 }
 0x314   :  { %880 = vmatprep.mubr.msk.f32.mxu1 %vm1175_vm0, %v1173_v0 }
 0x317   :  { %881 = vmatmul.mubr.msk.f32.gmra.mrb[12].mxu1 %vm327_vm1, %v1296_v47 }
 0x318   :  { %883 = vmatprep.mubr.msk.f32.mxu1 %vm1175_vm0, %v1173_v0 }
 0x31b   :  { %884 = vmatmul.mubr.msk.f32.gmra.mrb[14].mxu1 %vm327_vm1, %v1302_v52 }
 0x31c   :  { %886 = vmatprep.mubr.msk.f32.mxu1 %vm1175_vm0, %v1173_v0 }
 0x31f   :  { %887 = vmatmul.mubr.msk.f32.gmra.mrb[16].mxu1 %vm327_vm1, %v1308_v54 }
 0x3e6   :  { %v761_v39 = vpop.f32.mrb[20].mxu0  ;;  %v766_v32 = vpop.f32.mrb[10].mxu1 }
 0x3e7   :  { %v762_v40 = vadd.f32 %v761_v39, %v583_v5  ;;  %v767_v17 = vadd.f32 %v766_v32, %v589_v7  ;;  %v879_v18 = vpop.f32.mrb[11].mxu1  ;;  %v876_v19 = vpop.f32.mrb[21].mxu0 }
 0x3e9   :  { %785 = vst [vmem:[#allocation12] sm:$0xff] %v762_v40  ;;  %786 = vst [vmem:[#allocation12 + $0x8] sm:$0xff] %v767_v17 }
 0x3ea   :  { %v771_v47 = vpop.f32.mrb[12].mxu1 }
 0x3eb   :  { %v772_v21 = vadd.f32 %v771_v47, %v664_v9  ;;  %v882_v23 = vpop.f32.mrb[13].mxu1 }
 0x3ed   :  { %787 = vst [vmem:[#allocation12 + $0x10] sm:$0xff] %v772_v21 }
 0x3ee   :  { %v776_v24 = vpop.f32.mrb[14].mxu1 }
 0x3ef   :  { %v777_v52 = vadd.f32 %v776_v24, %v670_v12  ;;  %v885_v25 = vpop.f32.mrb[15].mxu1 }
 0x3f1   :  { %788 = vst [vmem:[#allocation12 + $0x18] sm:$0xff] %v777_v52 }
 0x3f2   :  { %v781_v0 = vpop.f32.mrb[16].mxu1 }
 0x3f3   :  { %v782_v54 = vadd.f32 %v781_v0, %v676_v15  ;;  %v888_v27 = vpop.f32.mrb[17].mxu1 }
 0x3f5   :  { %789 = vst [vmem:[#allocation12 + $0x20] sm:$0xff] %v782_v54 }
 0x3f6   :  { %1146 = shalt.err (!%p1143_p8)
}
 0x3f7   :  { %s1147_s17 = scalar_lea.hbm %s1371_s4, 640 }
 0x3f8   :  { %p1148_p9 = scmp.ne.s32.totalorder %s1371_s4, %s1147_s17  ;;  %p1151_p10 = scmp.lt.u32.totalorder %s1147_s17, %s1371_s4 }
 0x3fa   :  { %p1153_p11 = pnand %p1151_p10, %p1148_p9 }
 0x3fc   :  { %1156 = shalt.err (!%p1153_p11)
}
 0x3fd   :  { %801 = dma.vmem_to_hbm [thread:$0]  %s796_s13, 640, %s1371_s4, [#allocation6], %s1167_s27, %s1167_s27, %s1168_s28  }
 0x3fe   :  { %1163 = dma.done.wait [#allocation6], 640  }
 0x3ff   :  { %1164 = vsyncadd [#allocation6], 4294966656 }
 0x400   :  { %805 = vsyncpa [#allocation5], 1 }
 0x401   :  { %806 = vsyncpa [#allocation8], 1 }
 0x402   :  { %807 = vsyncpa [#allocation11], 1 }
 0x403   :  { %808 = vsyncpa [#allocation6], 1 }

</bundles_post_ra>
